<compile_context>
chip_gen: v5e
topology: v5e:2x2
jax: 0.10.0
libtpu: 0.0.40
codegen_flags: <defaults>
</compile_context>

<pallas_src>
import functools

import jax
import jax.numpy as jnp
from jax.experimental import pallas as pl
from jax.experimental.pallas import tpu as pltpu


# ----------------------------------------------------------------------------
# Bilinear interpolation matrix (align_corners=True), matching
# torch.nn.Upsample(mode='bilinear', align_corners=True).
# ----------------------------------------------------------------------------
def interp_matrix(out_size, in_size):
    # align_corners=True: scale = (in-1)/(out-1); out_size==1 samples coord 0.
    scale = (in_size - 1) / (out_size - 1) if out_size > 1 else 0.0
    src = jnp.arange(out_size, dtype=jnp.float32) * scale
    lo = jnp.clip(jnp.floor(src).astype(jnp.int32), 0, in_size - 1)
    hi = jnp.clip(lo + 1, 0, in_size - 1)
    frac = src - lo.astype(jnp.float32)
    rows = jnp.arange(out_size)
    w = jnp.zeros((out_size, in_size), jnp.float32)
    w = w.at[rows, lo].add(1.0 - frac)
    w = w.at[rows, hi].add(frac)
    return w


def _pick_batch_tile(n, m_in):
    # Smallest batch tile whose packed lane width is a multiple of 256 (MXU column width on
    # v6e/v7x); fall back to 128 (v5e); else the whole batch (a block equal to the full
    # array is always layout-legal).
    for target in (256, 128):
        for b in range(1, n + 1):
            if n % b == 0 and (b * m_in) % target == 0:
                return b
    return n


def _const_spec(shape):
    # Grid-invariant operand: single-buffer it when this JAX version supports pipeline_mode.
    idx = lambda i, j: (0, 0)
    try:
        return pl.BlockSpec(shape, idx, pipeline_mode=pl.Buffered(1))
    except Exception:  # older JAX without pipeline_mode / Buffered
        return pl.BlockSpec(shape, idx)


# ----------------------------------------------------------------------------
# Fused kernel (per grid step = one batch tile x one output-column tile):
#   1x1-conv MLP (bias folded) -> fused heads -> per-image bilinear upsample
#   -> optional hard one-hot.  Channels-first; spatial/batch on the lane axis.
# ----------------------------------------------------------------------------
def _segmentor_kernel(x_ref, w1a_ref, wfia_ref, ut_ref, sem_ref, inter_ref,
                      *, nc, bblk, m_in, hard):
    # x: (C+1, bblk*m_in) bf16, lanes packed (image, row, col); last row is ones (bias fold).
    x = x_ref[...]

    # 1x1-conv + ReLU, channels-first.  w1a's last row is [0..0, 1], so h keeps a ones row
    # alive through the ReLU that carries the head bias through the next matmul.
    h = jnp.dot(w1a_ref[...], x, preferred_element_type=jnp.float32)
    h = jnp.maximum(h, 0.0)

    # Both class heads fused: (2*nc, hidden+1) @ (hidden+1, bblk*m_in), f32 accumulate.
    heads = jnp.dot(wfia_ref[...], h.astype(jnp.bfloat16),
                    preferred_element_type=jnp.float32)

    ut = ut_ref[...]                                        # (m_in, m_out_blk) bf16
    for b in range(bblk):                                   # static, tiny trip count
        # Per-image bilinear upsample: lane-dense (2*nc, m_out_blk) result.
        plane = heads[:, b * m_in:(b + 1) * m_in].astype(jnp.bfloat16)
        up = jnp.dot(plane, ut, preferred_element_type=jnp.float32)

        logits = up[:nc]                                    # head 0 -> sem_seg
        inter_ref[b] = up[nc:].astype(inter_ref.dtype)      # head 1 -> inter_sem_seg (soft)

        if hard:
            # torch.zeros_like(x).scatter_(1, x.max(1, keepdim=True)[1], 1.)
            # Argmax over channels, first-max tie-break; computed on the bf16-rounded
            # logits so it is consistent with the emitted soft output.
            lg = logits.astype(jnp.bfloat16).astype(jnp.float32)
            m = jnp.max(lg, axis=0, keepdims=True)
            ch = jax.lax.broadcasted_iota(jnp.int32, lg.shape, 0)
            idx = jnp.min(jnp.where(lg == m, ch, nc), axis=0, keepdims=True)
            sem_ref[b] = (ch == idx).astype(sem_ref.dtype)
        else:
            sem_ref[b] = logits.astype(sem_ref.dtype)


@functools.partial(jax.jit, static_argnames=("stride", "out_h", "out_w", "hard"))
def segmentor_predict(img, w1a, wfia, *, stride, out_h, out_w, hard):
    n, c, h, w = img.shape
    hid1 = w1a.shape[0]                      # hidden + 1 (ones-row producer)
    nc = wfia.shape[0] // 2
    hs = -(-h // stride)
    ws = -(-w // stride)
    m_in = hs * ws
    m_out = out_h * out_w

    # Stride-s decimation + batch->lane packing + bias-fold ones row + bf16 cast, all in one
    # tiny XLA pass.  The kernel only ever DMAs the decimated bf16 pixels.
    x_ds = img[:, :, ::stride, ::stride]                          # (n, c, hs, ws)
    xp = x_ds.transpose(1, 0, 2, 3).reshape(c, n * m_in)           # channels-first, batch on lanes
    xp = jnp.concatenate([xp, jnp.ones((1, n * m_in), xp.dtype)], axis=0)
    xp = xp.astype(jnp.bfloat16)                                   # (c+1, n*m_in)

    # Bilinear (align_corners=True) upsample as a per-image Kronecker matmul.
    # TODO(synk): per-plane separable path for large resolutions (dense matrix is O(m_in*m_out)).
    ut = jnp.kron(interp_matrix(out_h, hs),
                  interp_matrix(out_w, ws)).T.astype(jnp.bfloat16)  # (m_in, m_out)

    bblk = _pick_batch_tile(n, m_in)
    out_tiles = 2 if m_out % 256 == 0 else 1     # 2nd parallel axis: feeds both v7x cores and
    m_out_blk = m_out // out_tiles               # halves the resident u^T block.

    kern = functools.partial(_segmentor_kernel, nc=nc, bblk=bblk, m_in=m_in, hard=hard)
    sem_flat, inter_flat = pl.pallas_call(
        kern,
        out_shape=(jax.ShapeDtypeStruct((n, nc, m_out), jnp.bfloat16),
                   jax.ShapeDtypeStruct((n, nc, m_out), jnp.bfloat16)),
        grid=(n // bblk, out_tiles),
        in_specs=[
            pl.BlockSpec((c + 1, bblk * m_in), lambda i, j: (0, i)),   # packed image tile
            _const_spec((hid1, c + 1)),                                # conv1 weight (+bias fold)
            _const_spec((2 * nc, hid1)),                               # fused heads (+bias fold)
            pl.BlockSpec((m_in, m_out_blk), lambda i, j: (0, j)),      # bilinear column block
        ],
        out_specs=(pl.BlockSpec((bblk, nc, m_out_blk), lambda i, j: (i, 0, j)),
                   pl.BlockSpec((bblk, nc, m_out_blk), lambda i, j: (i, 0, j))),
        compiler_params=pltpu.CompilerParams(
            dimension_semantics=("parallel", "parallel")),
    )(xp, w1a, wfia, ut)

    # Free metadata reshapes back to NCHW (already channel-first, row-major).
    return (sem_flat.reshape(n, nc, out_h, out_w),
            inter_flat.reshape(n, nc, out_h, out_w))


# ----------------------------------------------------------------------------
# Pure-JAX f32 reference of the same stand-in network (for the self-test).
# ----------------------------------------------------------------------------
def _reference(img, w1a, wfia, *, stride, out_h, out_w):
    nc = wfia.shape[0] // 2
    x = img[:, :, ::stride, ::stride].astype(jnp.bfloat16).astype(jnp.float32)
    hs, ws = x.shape[2], x.shape[3]
    w1 = w1a[:-1, :-1].astype(jnp.float32)
    b1 = w1a[:-1, -1].astype(jnp.float32)
    wfi = wfia[:, :-1].astype(jnp.float32)
    bfi = wfia[:, -1].astype(jnp.float32)
    feat = jnp.einsum('nchw,kc->nkhw', x, w1) + b1[None, :, None, None]
    feat = jnp.maximum(feat, 0.0)
    heads = jnp.einsum('nkhw,mk->nmhw', feat, wfi) + bfi[None, :, None, None]
    ih = interp_matrix(out_h, hs)
    iw = interp_matrix(out_w, ws)
    up = jnp.einsum('ip,nmpq,jq->nmij', ih, heads, iw)
    return up[:, :nc], up[:, nc:]


# ----------------------------------------------------------------------------
# Segmentor (inference forward)
# ----------------------------------------------------------------------------
class SegmentorPallas:
    def __init__(self, num_semantics=8, in_channels=3, hidden=32,
                 out_size=(16, 16), stride=2, key=None):
        if key is None:
            key = jax.random.PRNGKey(0)
        self.num_classes = num_semantics           # segment_eval_classes_only = False
        self.out_h, self.out_w = out_size          # opt.fixed_crop
        self.stride = stride
        k1, k2, k3, k4 = jax.random.split(key, 4)
        s = 0.1
        w1 = s * jax.random.normal(k1, (hidden, in_channels), jnp.float32)
        b1 = jnp.zeros((hidden, 1), jnp.float32)
        wf = s * jax.random.normal(k2, (num_semantics, hidden), jnp.float32)
        bf = s * jax.random.normal(k3, (num_semantics, 1), jnp.float32)
        wi = s * jax.random.normal(k4, (num_semantics, hidden), jnp.float32)
        bi = jnp.zeros((num_semantics, 1), jnp.float32)

        # Bias folding: W1a = [[W1 | b1], [0 .. 0 | 1]]  (the extra row emits a constant 1
        # through the ReLU so the head bias column of Wfia applies with no bias operands).
        ones_row = jnp.concatenate(
            [jnp.zeros((1, in_channels), jnp.float32), jnp.ones((1, 1), jnp.float32)], axis=1)
        self.w1a = jnp.concatenate(
            [jnp.concatenate([w1, b1], axis=1), ones_row], axis=0).astype(jnp.bfloat16)
        self.wfia = jnp.concatenate(
            [jnp.concatenate([wf, bf], axis=1),
             jnp.concatenate([wi, bi], axis=1)], axis=0).astype(jnp.bfloat16)

    def predict(self, img, hard=True):
        sem, inter = segmentor_predict(
            img, self.w1a, self.wfia,
            stride=self.stride, out_h=self.out_h, out_w=self.out_w, hard=hard)
        # expand_sem: identity (segment_eval_classes_only = False)
        return {'sem_seg': sem, 'inter_sem_seg': inter}

    def forward(self, data, mode='inference', hard=True):
        if mode == 'inference':
            return self.predict(data['img'], hard=hard)
        # TODO(synk): training modes (CriterionDSN/OHEM losses, advent discriminators,
        # bce_loss, optimizers, logger/checkpoint I/O) are not translated.
        raise NotImplementedError(mode)


if __name__ == "__main__":
    key = jax.random.PRNGKey(0)
    k_img, k_params = jax.random.split(key)
    N, C, H, W = 2, 3, 16, 16
    img = jax.random.normal(k_img, (N, C, H, W), jnp.float32)

    model = SegmentorPallas(num_semantics=8, in_channels=C, hidden=32,
                            out_size=(H, W), stride=2, key=k_params)

    out = model.forward({'img': img}, mode='inference', hard=True)
    sem = jax.block_until_ready(out['sem_seg'])
    inter = jax.block_until_ready(out['inter_sem_seg'])
    assert sem.shape == (N, 8, H, W) and sem.dtype == jnp.bfloat16
    assert inter.shape == (N, 8, H, W)

    # hard one-hot: exactly one class active per pixel
    sums = jnp.sum(sem.astype(jnp.float32), axis=1)
    assert bool(jnp.all(jnp.abs(sums - 1.0) < 1e-6))

    # soft path matches a pure-JAX f32 reference of the same network (bf16 tolerance)
    soft = model.forward({'img': img}, mode='inference', hard=False)
    soft_sem = jax.block_until_ready(soft['sem_seg']).astype(jnp.float32)
    soft_inter = soft['inter_sem_seg'].astype(jnp.float32)
    ref_sem, ref_inter = _reference(img, model.w1a, model.wfia,
                                    stride=2, out_h=H, out_w=W)
    assert bool(jnp.allclose(soft_sem, ref_sem, atol=2e-2, rtol=2e-2))
    assert bool(jnp.allclose(soft_inter, ref_inter, atol=2e-2, rtol=2e-2))

    # hard argmax agrees with the soft logits, and with the reference wherever the
    # reference's top-2 margin exceeds bf16 rounding noise
    hard_idx = jnp.argmax(sem, axis=1)
    assert bool(jnp.all(hard_idx == jnp.argmax(soft_sem, axis=1)))
    top2 = jnp.sort(ref_sem, axis=1)[:, -2:]
    margin_ok = (top2[:, 1] - top2[:, 0]) > 1e-2
    ref_idx = jnp.argmax(ref_sem, axis=1)
    assert bool(jnp.all(jnp.where(margin_ok, hard_idx == ref_idx, True)))

    print("KERNEL_OK")
</pallas_src>

<mosaic_0001>
module attributes {stable_mosaic.version = 11 : i64} {
  func.func @_segmentor_kernel(%arg0: i32, %arg1: i32, %arg2: memref<4x128xbf16, #tpu.memory_space<vmem>>, %arg3: memref<33x4xbf16, #tpu.memory_space<vmem>>, %arg4: memref<16x33xbf16, #tpu.memory_space<vmem>>, %arg5: memref<64x128xbf16, #tpu.memory_space<vmem>>, %arg6: memref<2x8x128xbf16, #tpu.memory_space<vmem>>, %arg7: memref<2x8x128xbf16, #tpu.memory_space<vmem>>) attributes {dimension_semantics = [#tpu.dimension_semantics<parallel>, #tpu.dimension_semantics<parallel>], iteration_bounds = array<i64: 1, 2>, scalar_prefetch = 0 : i64, scratch_operands = 0 : i64, tpu.core_type = #tpu.core_type<tc>, window_params = [{transform_indices = @transform_0, window_bounds = array<i64: 4, 128>}, {pipeline_mode = #tpu.pipeline_mode<synchronous>, transform_indices = @transform_1, window_bounds = array<i64: 33, 4>}, {pipeline_mode = #tpu.pipeline_mode<synchronous>, transform_indices = @transform_2, window_bounds = array<i64: 16, 33>}, {transform_indices = @transform_3, window_bounds = array<i64: 64, 128>}, {transform_indices = @transform_4, window_bounds = array<i64: 2, 8, 128>}, {transform_indices = @transform_5, window_bounds = array<i64: 2, 8, 128>}]} {
    %c0 = arith.constant 0 : index
    %c0_0 = arith.constant 0 : index
    %0 = vector.load %arg2[%c0, %c0_0] : memref<4x128xbf16, #tpu.memory_space<vmem>>, vector<4x128xbf16>
    %c0_1 = arith.constant 0 : index
    %c0_2 = arith.constant 0 : index
    %1 = vector.load %arg3[%c0_1, %c0_2] : memref<33x4xbf16, #tpu.memory_space<vmem>>, vector<33x4xbf16>
    %cst = arith.constant dense<0.000000e+00> : vector<33x128xf32>
    %2 = tpu.matmul %1, %0, %cst {dimension_numbers = #tpu.dot_dimension_numbers<[1], [0], [0], [1], [0, 0, 1, 1], [], []>} : vector<33x4xbf16>, vector<4x128xbf16>, vector<33x128xf32> -> vector<33x128xf32>
    %cst_3 = arith.constant 0.000000e+00 : f32
    %3 = vector.broadcast %cst_3 : f32 to vector<33x128xf32>
    %4 = arith.maximumf %2, %3 : vector<33x128xf32>
    %c0_4 = arith.constant 0 : index
    %c0_5 = arith.constant 0 : index
    %5 = vector.load %arg4[%c0_4, %c0_5] : memref<16x33xbf16, #tpu.memory_space<vmem>>, vector<16x33xbf16>
    %6 = arith.truncf %4 : vector<33x128xf32> to vector<33x128xbf16>
    %cst_6 = arith.constant dense<0.000000e+00> : vector<16x128xf32>
    %7 = tpu.matmul %5, %6, %cst_6 {dimension_numbers = #tpu.dot_dimension_numbers<[1], [0], [0], [1], [0, 0, 1, 1], [], []>} : vector<16x33xbf16>, vector<33x128xbf16>, vector<16x128xf32> -> vector<16x128xf32>
    %c0_7 = arith.constant 0 : index
    %c0_8 = arith.constant 0 : index
    %8 = vector.load %arg5[%c0_7, %c0_8] : memref<64x128xbf16, #tpu.memory_space<vmem>>, vector<64x128xbf16>
    %9 = vector.extract_strided_slice %7 {offsets = [0, 0], sizes = [16, 64], strides = [1, 1]} : vector<16x128xf32> to vector<16x64xf32>
    %10 = arith.truncf %9 : vector<16x64xf32> to vector<16x64xbf16>
    %cst_9 = arith.constant dense<0.000000e+00> : vector<16x128xf32>
    %11 = tpu.matmul %10, %8, %cst_9 {dimension_numbers = #tpu.dot_dimension_numbers<[1], [0], [0], [1], [0, 0, 1, 1], [], []>} : vector<16x64xbf16>, vector<64x128xbf16>, vector<16x128xf32> -> vector<16x128xf32>
    %12 = vector.extract_strided_slice %11 {offsets = [0, 0], sizes = [8, 128], strides = [1, 1]} : vector<16x128xf32> to vector<8x128xf32>
    %13 = vector.extract_strided_slice %11 {offsets = [8, 0], sizes = [8, 128], strides = [1, 1]} : vector<16x128xf32> to vector<8x128xf32>
    %14 = arith.truncf %13 : vector<8x128xf32> to vector<8x128xbf16>
    %c0_10 = arith.constant 0 : index
    %c0_11 = arith.constant 0 : index
    %c0_12 = arith.constant 0 : index
    %15 = vector.load %arg7[%c0_10, %c0_11, %c0_12] : memref<2x8x128xbf16, #tpu.memory_space<vmem>>, vector<1x8x128xbf16>
    %16 = vector.shape_cast %15 : vector<1x8x128xbf16> to vector<8x128xbf16>
    %17 = vector.shape_cast %14 : vector<8x128xbf16> to vector<1x8x128xbf16>
    tpu.vector_store %arg7[%c0_10, %c0_11, %c0_12], %17 {strides = array<i32>} : memref<2x8x128xbf16, #tpu.memory_space<vmem>>, vector<1x8x128xbf16>,
    %18 = arith.truncf %12 : vector<8x128xf32> to vector<8x128xbf16>
    %19 = arith.extf %18 : vector<8x128xbf16> to vector<8x128xf32>
    %cst_13 = arith.constant dense<0xFF800000> : vector<128xf32>
    %20 = vector.multi_reduction <maximumf>, %19, %cst_13 [0] : vector<8x128xf32> to vector<128xf32>
    %21 = vector.shape_cast %20 : vector<128xf32> to vector<1x128xf32>
    %22 = tpu.iota {dimensions = array<i32: 0>} : vector<8x128xi32>
    %23 = vector.broadcast %21 : vector<1x128xf32> to vector<8x128xf32>
    %24 = arith.cmpf oeq, %19, %23 : vector<8x128xf32>
    %c8_i32 = arith.constant 8 : i32
    %25 = vector.broadcast %c8_i32 : i32 to vector<8x128xi32>
    %26 = arith.select %24, %22, %25 : vector<8x128xi1>, vector<8x128xi32>
    %cst_14 = arith.constant dense<2147483647> : vector<128xi32>
    %27 = vector.multi_reduction <minsi>, %26, %cst_14 [0] : vector<8x128xi32> to vector<128xi32>
    %28 = vector.shape_cast %27 : vector<128xi32> to vector<1x128xi32>
    %29 = vector.broadcast %28 : vector<1x128xi32> to vector<8x128xi32>
    %30 = arith.cmpi eq, %22, %29 : vector<8x128xi32>
    %31 = arith.extui %30 : vector<8x128xi1> to vector<8x128xi32>
    %32 = arith.sitofp %31 : vector<8x128xi32> to vector<8x128xf32>
    %33 = arith.truncf %32 : vector<8x128xf32> to vector<8x128xbf16>
    %c0_15 = arith.constant 0 : index
    %c0_16 = arith.constant 0 : index
    %c0_17 = arith.constant 0 : index
    %34 = vector.load %arg6[%c0_15, %c0_16, %c0_17] : memref<2x8x128xbf16, #tpu.memory_space<vmem>>, vector<1x8x128xbf16>
    %35 = vector.shape_cast %34 : vector<1x8x128xbf16> to vector<8x128xbf16>
    %36 = vector.shape_cast %33 : vector<8x128xbf16> to vector<1x8x128xbf16>
    tpu.vector_store %arg6[%c0_15, %c0_16, %c0_17], %36 {strides = array<i32>} : memref<2x8x128xbf16, #tpu.memory_space<vmem>>, vector<1x8x128xbf16>,
    %37 = vector.extract_strided_slice %7 {offsets = [0, 64], sizes = [16, 64], strides = [1, 1]} : vector<16x128xf32> to vector<16x64xf32>
    %38 = arith.truncf %37 : vector<16x64xf32> to vector<16x64xbf16>
    %cst_18 = arith.constant dense<0.000000e+00> : vector<16x128xf32>
    %39 = tpu.matmul %38, %8, %cst_18 {dimension_numbers = #tpu.dot_dimension_numbers<[1], [0], [0], [1], [0, 0, 1, 1], [], []>} : vector<16x64xbf16>, vector<64x128xbf16>, vector<16x128xf32> -> vector<16x128xf32>
    %40 = vector.extract_strided_slice %39 {offsets = [0, 0], sizes = [8, 128], strides = [1, 1]} : vector<16x128xf32> to vector<8x128xf32>
    %41 = vector.extract_strided_slice %39 {offsets = [8, 0], sizes = [8, 128], strides = [1, 1]} : vector<16x128xf32> to vector<8x128xf32>
    %42 = arith.truncf %41 : vector<8x128xf32> to vector<8x128xbf16>
    %c1 = arith.constant 1 : index
    %c0_19 = arith.constant 0 : index
    %c0_20 = arith.constant 0 : index
    %43 = vector.load %arg7[%c1, %c0_19, %c0_20] : memref<2x8x128xbf16, #tpu.memory_space<vmem>>, vector<1x8x128xbf16>
    %44 = vector.shape_cast %43 : vector<1x8x128xbf16> to vector<8x128xbf16>
    %45 = vector.shape_cast %42 : vector<8x128xbf16> to vector<1x8x128xbf16>
    tpu.vector_store %arg7[%c1, %c0_19, %c0_20], %45 {strides = array<i32>} : memref<2x8x128xbf16, #tpu.memory_space<vmem>>, vector<1x8x128xbf16>,
    %46 = arith.truncf %40 : vector<8x128xf32> to vector<8x128xbf16>
    %47 = arith.extf %46 : vector<8x128xbf16> to vector<8x128xf32>
    %cst_21 = arith.constant dense<0xFF800000> : vector<128xf32>
    %48 = vector.multi_reduction <maximumf>, %47, %cst_21 [0] : vector<8x128xf32> to vector<128xf32>
    %49 = vector.shape_cast %48 : vector<128xf32> to vector<1x128xf32>
    %50 = tpu.iota {dimensions = array<i32: 0>} : vector<8x128xi32>
    %51 = vector.broadcast %49 : vector<1x128xf32> to vector<8x128xf32>
    %52 = arith.cmpf oeq, %47, %51 : vector<8x128xf32>
    %c8_i32_22 = arith.constant 8 : i32
    %53 = vector.broadcast %c8_i32_22 : i32 to vector<8x128xi32>
    %54 = arith.select %52, %50, %53 : vector<8x128xi1>, vector<8x128xi32>
    %cst_23 = arith.constant dense<2147483647> : vector<128xi32>
    %55 = vector.multi_reduction <minsi>, %54, %cst_23 [0] : vector<8x128xi32> to vector<128xi32>
    %56 = vector.shape_cast %55 : vector<128xi32> to vector<1x128xi32>
    %57 = vector.broadcast %56 : vector<1x128xi32> to vector<8x128xi32>
    %58 = arith.cmpi eq, %50, %57 : vector<8x128xi32>
    %59 = arith.extui %58 : vector<8x128xi1> to vector<8x128xi32>
    %60 = arith.sitofp %59 : vector<8x128xi32> to vector<8x128xf32>
    %61 = arith.truncf %60 : vector<8x128xf32> to vector<8x128xbf16>
    %c1_24 = arith.constant 1 : index
    %c0_25 = arith.constant 0 : index
    %c0_26 = arith.constant 0 : index
    %62 = vector.load %arg6[%c1_24, %c0_25, %c0_26] : memref<2x8x128xbf16, #tpu.memory_space<vmem>>, vector<1x8x128xbf16>
    %63 = vector.shape_cast %62 : vector<1x8x128xbf16> to vector<8x128xbf16>
    %64 = vector.shape_cast %61 : vector<8x128xbf16> to vector<1x8x128xbf16>
    tpu.vector_store %arg6[%c1_24, %c0_25, %c0_26], %64 {strides = array<i32>} : memref<2x8x128xbf16, #tpu.memory_space<vmem>>, vector<1x8x128xbf16>,
    return
  }
  func.func @transform_0(%arg0: i32, %arg1: i32) -> (i32, i32) {
    %c0_i32 = arith.constant 0 : i32
    %c0_i32_0 = arith.constant 0 : i32
    return %c0_i32, %arg0 : i32, i32
  }
  func.func @transform_1(%arg0: i32, %arg1: i32) -> (i32, i32) {
    %c0_i32 = arith.constant 0 : i32
    %c0_i32_0 = arith.constant 0 : i32
    %c0_i32_1 = arith.constant 0 : i32
    return %c0_i32, %c0_i32_0 : i32, i32
  }
  func.func @transform_2(%arg0: i32, %arg1: i32) -> (i32, i32) {
    %c0_i32 = arith.constant 0 : i32
    %c0_i32_0 = arith.constant 0 : i32
    %c0_i32_1 = arith.constant 0 : i32
    return %c0_i32, %c0_i32_0 : i32, i32
  }
  func.func @transform_3(%arg0: i32, %arg1: i32) -> (i32, i32) {
    %c0_i32 = arith.constant 0 : i32
    %c0_i32_0 = arith.constant 0 : i32
    return %c0_i32, %arg1 : i32, i32
  }
  func.func @transform_4(%arg0: i32, %arg1: i32) -> (i32, i32, i32) {
    %c0_i32 = arith.constant 0 : i32
    %c0_i32_0 = arith.constant 0 : i32
    return %arg0, %c0_i32, %arg1 : i32, i32, i32
  }
  func.func @transform_5(%arg0: i32, %arg1: i32) -> (i32, i32, i32) {
    %c0_i32 = arith.constant 0 : i32
    %c0_i32_0 = arith.constant 0 : i32
    return %arg0, %c0_i32, %arg1 : i32, i32, i32
  }
}

</mosaic_0001>

<bundles_post_ra>
// kernel: segmentor_predict.1
= control target key start
LH: loop header
LB: loop body
LE: loop exit
PB: predicated region body
PF: predicated region fallthrough
CT: control target
= control target key end

     0   :  { %s960_s18 = smov 0   ;;  %s962_s19 = smov 0   ;;  %s1069_s0 = inlined_call_operand.vmem [shape: bf16[4,128], index: 0, kind: input, shape index: {}]   ;;  %s1070_s1 = inlined_call_operand.vmem [shape: bf16[33,4], index: 1, kind: input, shape index: {}]   ;;  %s1071_s2 = inlined_call_operand.vmem [shape: bf16[16,33], index: 2, kind: input, shape index: {}]   ;;  %s1072_s3 = inlined_call_operand.vmem [shape: bf16[64,256], index: 3, kind: input, shape index: {}]   ;;  %s1073_s4 = inlined_call_operand.vmem [shape: bf16[2,8,256], index: 4, kind: output, shape index: {0}]   ;;  %s1074_s5 = inlined_call_operand.vmem [shape: bf16[2,8,256], index: 5, kind: output, shape index: {1}]  }
   0x1   :  { %s964_s20 = smov 0   ;;  %s966_s21 = smov 0  }
   0x2   :  { %s968_s22 = smov 0  }
   0x3 LB: > { %s25_s23 = sadd.s32 1, %s921_s21  ;;  %s781_s24 = sadd.s32 4294967295, %s925_s22   ;;  %s925_s22 = sphi %s968_s22, %s16_s22   ;;  %s921_s21 = sphi %s966_s21, %s1079_s21   ;;  %s917_s20 = sphi %s964_s20, %s1078_s20   ;;  %s913_s19 = sphi %s962_s19, %s1077_s19   ;;  %s909_s18 = sphi %s960_s18, %s1076_s18  }
   0x4   : > { %p26_p0 = scmp.ge.s32.totalorder %s25_s23, 2  ;;  %p110_p1 = scmp.ne.s32.totalorder %s913_s19, %s909_s18 }
   0x5   : > { %p111_p2 = scmp.eq.s32.totalorder %s925_s22, 0  ;;  %p142_p4 = scmp.eq.s32.totalorder %s781_s24, 1 }
   0x6   : > { %s1081_s23 = smov (%p26_p0, %s25_s23), 0  ;;  %s103_s26 = sadd.s32 1, %s913_s19 }
   0x7   : > { %p112_p3 = por %p111_p2, %p110_p1  ;;  %s100_s25 = ssub.s32 %s921_s21, %s1081_s23 }
   0x8   : > { %p101_p5 = scmp.eq.s32.totalorder %s100_s25, 0  ;;  %p995_p6 = por %p142_p4, %p110_p1 }
   0x9   : > { %p785_p7 = scmp.ge.s32.totalorder %s925_s22, 2 }
   0xa   : > { %s1000_s28 = scalar_select %p101_p5, %s913_s19, %s103_s26  }
   0xb   : > { %205 = sbr.rel (%p785_p7) target bundleno = 28 (0x1c), region = 28 }
  0x10   : > { %208 = sbr.rel (!%p112_p3) target bundleno = 28 (0x1c), region = 32  ;;  %s210_s29 = sand.u32 (%p112_p3), 1, %s913_s19  }
  0x11   : > { %s787_s30 = sshll.u32 (%p112_p3), %s921_s21, 2  ;;  %s786_s6 = sshll.u32 (%p112_p3), %s210_s29, 5 }
  0x12   : > { %s214_s9 = scalar_lea.vmem (%p112_p3), %s1072_s3, %s787_s30  ;;  %s212_s10 = scalar_lea.vmem (%p112_p3), [#allocation2], %s786_s6 }
  0x13   : > { %v231_v0 = vld [vmem:[%s214_s9] sm:$0xf] (%p112_p3)  ;;  %v233_v1 = vld [vmem:[%s214_s9 + $0x8] sm:$0xf] (%p112_p3)  ;;  %v235_v2 = vld [vmem:[%s214_s9 + $0x10] sm:$0xf] (%p112_p3) }
  0x14   : > { %232 = vst [vmem:[%s212_s10] sm:$0xf] (%p112_p3), %v231_v0  ;;  %v237_v3 = vld [vmem:[%s214_s9 + $0x18] sm:$0xf] (%p112_p3)  ;;  %v239_v4 = vld [vmem:[%s214_s9 + $0x20] sm:$0xf] (%p112_p3) }
  0x15   : > { %234 = vst [vmem:[%s212_s10 + $0x4] sm:$0xf] %v233_v1  ;;  %v241_v5 = vld [vmem:[%s214_s9 + $0x28] sm:$0xf]  ;;  %v243_v6 = vld [vmem:[%s214_s9 + $0x30] sm:$0xf] }
  0x16   : > { %236 = vst [vmem:[%s212_s10 + $0x8] sm:$0xf] %v235_v2  ;;  %v245_v7 = vld [vmem:[%s214_s9 + $0x38] sm:$0xf] }
  0x17   : > { %238 = vst [vmem:[%s212_s10 + $0xc] sm:$0xf] %v237_v3 }
  0x18   : > { %240 = vst [vmem:[%s212_s10 + $0x10] sm:$0xf] %v239_v4 }
  0x19   : > { %242 = vst [vmem:[%s212_s10 + $0x14] sm:$0xf] %v241_v5 }
  0x1a   : > { %244 = vst [vmem:[%s212_s10 + $0x18] sm:$0xf] %v243_v6 }
  0x1b   : > { %246 = vst [vmem:[%s212_s10 + $0x1c] sm:$0xf] %v245_v7 }
  0x1c PF: > { %p788_p8 = scmp.ge.s32.totalorder %s925_s22, 1  ;;  %p285_p9 = scmp.lt.s32.totalorder %s925_s22, 3 }
  0x1e   : > { %p286_p10 = pnand %p788_p8, %p285_p9 }
  0x1f   : > { %s292_s25 = sand.u32 (!%p286_p10), 1, %s909_s18   ;;  %s928_s7 = smov (!%p286_p10), 64  }
  0x20   : > { %289 = sbr.rel (%p286_p10) target bundleno = 634 (0x27a), region = 73  ;;  %s789_s26 = sshll.u32 (!%p286_p10), %s292_s25, 5 }
  0x21   : > { %s294_s29 = scalar_lea.vmem (!%p286_p10), [#allocation2], %s789_s26  ;;  %s790_s8 = sshll.u32 (!%p286_p10), %s292_s25, 3 }
  0x22   : > { %s1030_s9 = scalar_lea.vmem (!%p286_p10), [#allocation4], %s790_s8  ;;  %s1033_s18 = scalar_lea.vmem (!%p286_p10), [#allocation3], %s790_s8 }
  0x25   : > { %v333_v8 = vld [vmem:[%s1069_s0] sm:$0x3]  ;;  %vm362_vm0 = vcmask 1041408   ;;  %v338_v11 = vld [vmem:[%s1070_s1 + $0x10] sm:$0x1]  ;;  %vm352_vm1 = vcmask 31744   ;;  %v489_v49 = vlaneseq }
  0x26   : > { %v364_v9 = vsel %vm362_vm0, %v333_v8, 0  ;;  %v836_v10 = vld [vmem:[%s1070_s1] sm:$0xff]  ;;  %v348_v12 = vunpack.c.l.b16 %v338_v11  ;;  %v837_v14 = vld [vmem:[%s1070_s1 + $0x8] sm:$0xff]  ;;  %vm408_vm2 = vcmask 1040384   ;;  %v927_v18 = vmov 0   ;;  %v842_v21 = vld [vmem:[%s294_s29 + $0x18] sm:$0xff] }
  0x27   : > { %373 = vmatpush.bf16.msra.mxu0 %v364_v9  ;;  %843 = vmatpush.bf16.msra.mxu1 %v364_v9  ;;  %v410_v19 = vsel %vm408_vm2, 65535, %v927_v18  ;;  %v838_v33 = vld [vmem:[%s1071_s2] sm:$0xff]  ;;  %vm404_vm3 = vcmask 269312   ;;  %v841_v34 = vld [vmem:[%s294_s29 + $0x10] sm:$0xff]  ;;  %v840_v35 = vld [vmem:[%s294_s29 + $0x8] sm:$0xff]  ;;  %vm461_vm4 = vcmask 523264  }
  0x28   : > { %v351_v13 = vpack.c.b16 %v348_v12, %v348_v12  ;;  %469 = vmatpush.bf16.msra.mxu2 %v842_v21  ;;  %517 = vmatpush.bf16.msra.mxu3 %v842_v21  ;;  %v839_v36 = vld [vmem:[%s294_s29] sm:$0xff]  ;;  %v490_v52 = vshrl.u32 %v489_v49, 7  ;;  %v929_v61 = vmov 0.0   ;;  %s832_s10 = sshll.u32 (%p995_p6), %s917_s20, 2 }
  0x29   : > { %s570_s13 = scalar_lea.vmem (%p995_p6), %s1073_s4, %s832_s10 }
  0x2a   : > { %800 = vmatmul.msk.bf16.vlgmr.msra.gmra.mxu0 %vm352_vm1, %v836_v10  ;;  %802 = vmatmul.msk.bf16.vlgmr.msra.gmra.mxu1 %vm352_vm1, %v351_v13 }
  0x2c   : > { %470 = vmatpush.bf16.msra.mxu2 %v841_v34  ;;  %518 = vmatpush.bf16.msra.mxu3 %v841_v34 }
  0x30   : > { %471 = vmatpush.bf16.msra.mxu2 %v840_v35  ;;  %519 = vmatpush.bf16.msra.mxu3 %v840_v35 }
  0x34   : > { %472 = vmatpush.bf16.msra.mxu2 %v839_v36  ;;  %520 = vmatpush.bf16.msra.mxu3 %v839_v36 }
  0x3a   : > { %801 = vmatmul.msk.bf16.gmra.mxu0 %vm352_vm1, %v837_v14 }
  0xa7   : > { %v375_v15 = vpop.f32.mrf.mxu0  ;;  %v385_v16 = vpop.f32.mrf.mxu1 }
  0xa8   : > { %v393_v17 = vmax.f32 %v385_v16, 0.0  ;;  %v389_v31 = vmax.f32 %v375_v15, 0.0 }
  0xaa   : > { %v398_v20 = vpack.c.bf16 %v393_v17, %v393_v17 }
  0xac   : > { %v412_v22 = vand.u32 %v410_v19, %v398_v20 }
  0xae   : > { %419 = vmatpush.bf16.msrb.mxu1 %v412_v22 }
  0xaf   : > { %v377_v23 = vpop.f32.mrf.mxu0  ;;  %v387_v24 = vpop.f32.mrf.mxu1 }
  0xb0   : > { %v390_v29 = vmax.f32 %v377_v23, 0.0 }
  0xb2   : > { %v396_v32 = vpack.c.bf16 %v390_v29, %v389_v31 }
  0xb7   : > { %v380_v25 = vpop.f32.mrf.mxu0 }
  0xb8   : > { %v391_v27 = vmax.f32 %v380_v25, 0.0 }
  0xbf   : > { %v382_v26 = vpop.f32.mrf.mxu0 }
  0xc0   : > { %v392_v28 = vmax.f32 %v382_v26, 0.0 }
  0xc2   : > { %v397_v30 = vpack.c.bf16 %v392_v28, %v391_v27 }
  0xc4   : > { %420 = vmatpush.bf16.msrb.mxu1 %v397_v30 }
  0xc8   : > { %421 = vmatpush.bf16.msrb.mxu1 %v396_v32 }
  0xcb   : > { %807 = vmatmul.msk.bf16.vlgmr.msrb.gmra.mxu1 %vm404_vm3, %v838_v33 }
 0x148   : > { %v423_v37 = vpop.f32.mrf.mxu1 }
 0x150   : > { %v425_v38 = vpop.f32.mrf.mxu1 }
 0x151   : > { %v436_v39 = vpack.c.bf16 %v425_v38, %v423_v37 }
 0x153   : > { %824 = vmatmul.msk.bf16.vlgmr.msra.gmra.mxu2 %vm461_vm4, %v436_v39  ;;  %508 = vrot.lane.b32.xlu0 %v436_v39, %s928_s7 }
 0x1c5   : > { %v509_v40 = vpop.permute.xlu0 %508 }
 0x1c6   : > { %826 = vmatmul.msk.bf16.vlgmr.msra.gmra.mxu3 %vm461_vm4, %v509_v40 }
 0x1d6   : > { %v474_v41 = vpop.f32.mrf.mxu2 }
 0x1d7   : > { %v481_v42 = vpack.c.bf16 %v474_v41, %v474_v41 }
 0x1d9   : > { %v482_v43 = vunpack.c.l.bf16 %v481_v42 }
 0x1db   : > { %v483_v44 = vrot.slane %v482_v43, 4 }
 0x1dd   : > { %v484_v45 = vmax.f32 %v482_v43, %v483_v44 }
 0x1de   : > { %v476_v46 = vpop.f32.mrf.mxu2 }
 0x1df   : > { %v485_v47 = vrot.slane %v484_v45, 2  ;;  %v479_v48 = vpack.c.bf16 %v476_v46, %v476_v46 }
 0x1e1   : > { %v486_v50 = vmax.f32 %v484_v45, %v485_v47  ;;  %480 = vst [vmem:[%s1030_s9] sm:$0xf] %v479_v48 }
 0x1e3   : > { %v487_v51 = vrot.slane %v486_v50, 1 }
 0x1e5   : > { %v488_v53 = vmax.f32 %v486_v50, %v487_v51 }
 0x1e7   : > { %vm491_vm5 = vcmp.eq.f32.partialorder %v482_v43, %v488_v53 }
 0x1e8   : > { %v492_v54 = vsel %vm491_vm5, %v490_v52, 8 }
 0x1e9   : > { %v493_v55 = vrot.slane %v492_v54, 4 }
 0x1eb   : > { %vm494_vm6 = vcmp.lt.s32.totalorder %v492_v54, %v493_v55 }
 0x1ec   : > { %v495_v56 = vsel %vm494_vm6, %v492_v54, %v493_v55 }
 0x1ed   : > { %v496_v57 = vrot.slane %v495_v56, 2 }
 0x1ef   : > { %vm497_vm7 = vcmp.lt.s32.totalorder %v495_v56, %v496_v57 }
 0x1f0   : > { %v498_v58 = vsel %vm497_vm7, %v495_v56, %v496_v57 }
 0x1f1   : > { %v499_v59 = vrot.slane %v498_v58, 1 }
 0x1f3   : > { %vm500_vm8 = vcmp.lt.s32.totalorder %v498_v58, %v499_v59 }
 0x1f4   : > { %v501_v60 = vsel %vm500_vm8, %v498_v58, %v499_v59 }
 0x1f5   : > { %vm502_vm9 = vcmp.eq.s32.totalorder %v490_v52, %v501_v60 }
 0x1f6   : > { %v825_v62 = vsel %vm502_vm9, 1.0, %v929_v61 }
 0x1f7   : > { %v505_v63 = vpack.c.bf16 %v825_v62, %v825_v62 }
 0x1f9   : > { %506 = vst [vmem:[%s1033_s18] sm:$0xf] %v505_v63 }
 0x200   : > { %v587_v20 = vld [vmem:[%s1033_s18] sm:$0xf] (%p995_p6) }
 0x201   : > { %588 = vst [vmem:[%s570_s13] sm:$0xf] (%p995_p6), %v587_v20 }
 0x249   : > { %v522_v0 = vpop.f32.mrf.mxu3 }
 0x24a   : > { %v530_v1 = vpack.c.bf16 %v522_v0, %v522_v0 }
 0x24c   : > { %v531_v2 = vunpack.c.l.bf16 %v530_v1 }
 0x24e   : > { %v532_v3 = vrot.slane %v531_v2, 4 }
 0x250   : > { %v533_v4 = vmax.f32 %v531_v2, %v532_v3 }
 0x251   : > { %v524_v5 = vpop.f32.mrf.mxu3 }
 0x252   : > { %v534_v6 = vrot.slane %v533_v4, 2  ;;  %v527_v7 = vpack.c.bf16 %v524_v5, %v524_v5 }
 0x254   : > { %v535_v8 = vmax.f32 %v533_v4, %v534_v6  ;;  %827 = vst [vmem:[%s1030_s9 + $0x4] sm:$0xf] %v527_v7 }
 0x256   : > { %v536_v9 = vrot.slane %v535_v8, 1 }
 0x258   : > { %v537_v10 = vmax.f32 %v535_v8, %v536_v9 }
 0x25a   : > { %vm538_vm10 = vcmp.eq.f32.partialorder %v531_v2, %v537_v10 }
 0x25b   : > { %v539_v11 = vsel %vm538_vm10, %v490_v52, 8 }
 0x25c   : > { %v540_v12 = vrot.slane %v539_v11, 4 }
 0x25e   : > { %vm541_vm11 = vcmp.lt.s32.totalorder %v539_v11, %v540_v12 }
 0x25f   : > { %v542_v13 = vsel %vm541_vm11, %v539_v11, %v540_v12 }
 0x260   : > { %v543_v14 = vrot.slane %v542_v13, 2 }
 0x262   : > { %vm544_vm12 = vcmp.lt.s32.totalorder %v542_v13, %v543_v14 }
 0x263   : > { %v545_v15 = vsel %vm544_vm12, %v542_v13, %v543_v14 }
 0x264   : > { %v546_v16 = vrot.slane %v545_v15, 1 }
 0x266   : > { %vm547_vm13 = vcmp.lt.s32.totalorder %v545_v15, %v546_v16 }
 0x267   : > { %v548_v17 = vsel %vm547_vm13, %v545_v15, %v546_v16 }
 0x268   : > { %vm549_vm14 = vcmp.eq.s32.totalorder %v490_v52, %v548_v17  ;;  %565 = sbr.rel (!%p995_p6) target bundleno = 629 (0x275), region = 81 }
 0x269   : > { %v828_v18 = vsel %vm549_vm14, 1.0, %v929_v61 }
 0x26a   : > { %v552_v19 = vpack.c.bf16 %v828_v18, %v828_v18 }
 0x26c   : > { %829 = vst [vmem:[%s1033_s18 + $0x4] sm:$0xf] %v552_v19 }
 0x273   : > { %v589_v21 = vld [vmem:[%s1033_s18 + $0x4] sm:$0xf] }
 0x274   : > { %590 = vst [vmem:[%s570_s13 + $0x8] sm:$0xf] %v589_v21 }
 0x275 PF: > { %618 = sbr.rel (!%p995_p6) target bundleno = 634 (0x27a), region = 122  ;;  %s833_s14 = sshll.u32 (%p995_p6), %s917_s20, 2  ;;  %v640_v22 = vld [vmem:[%s1030_s9] sm:$0xf] (%p995_p6)  ;;  %v642_v23 = vld [vmem:[%s1030_s9 + $0x4] sm:$0xf] (%p995_p6) }
 0x276   : > { %s623_s17 = scalar_lea.vmem (%p995_p6), %s1074_s5, %s833_s14 }
 0x277   : > { %641 = vst [vmem:[%s623_s17] sm:$0xf] (%p995_p6), %v640_v22 }
 0x278   : > { %643 = vst [vmem:[%s623_s17 + $0x8] sm:$0xf] (%p995_p6), %v642_v23 }
 0x27a PF: > { %s16_s22 = sadd.s32 1, %s925_s22   ;;  %s1076_s18 = smov %s913_s19 }
 0x27b   : > { %p13_p11 = scmp.ge.s32.totalorder %s16_s22, 4   ;;  %s1077_s19 = smov %s1000_s28 }
 0x27c   : > { %s1078_s20 = smov %s921_s21  ;;  %s1079_s21 = smov %s1081_s23 }
 0x27d   :  { %15 = sbr.rel (!%p13_p11) target bundleno = 3 (0x3), region = 211 }

</bundles_post_ra>
